<compile_context>
chip_gen: v7x
topology: tpu7x:2x2x1
jax: 0.10.0
libtpu: 0.0.40
codegen_flags: <defaults>
</compile_context>

<pallas_src>
import functools

import jax
import jax.numpy as jnp
from jax import lax
from jax.experimental import pallas as pl
from jax.experimental.pallas import tpu as pltpu


def _round_up(x, m):
    return ((x + m - 1) // m) * m


def _pick_time_chunk(t, max_chunk):
    cap = max(8, (max_chunk // 8) * 8)            # multiple of 8 (sublane tile)
    return min(cap, _round_up(t, 8))


def _pick_vocab_tile(vp, max_tile):
    cap = min(vp, max(128, (max_tile // 128) * 128))
    for t in range(cap, 0, -128):                 # largest 128-multiple dividing Vp
        if vp % t == 0:
            return t
    return 128


def _fused_rnn_kernel(tok_ref, h0_ref, bias_ref, wih_ref, whh_ref, wout_ref,
                      bout_ref, out_ref, hT_ref, h_carry, hs_buf,
                      *, t_total, sub, time_guard):
    """One grid step == (time chunk c, vocab tile v).

    v == 0 : build pre_t = one_hot(tok_t) @ W_ih^T + b for the whole chunk
             (MXU, `sub` steps at a time), run the serial tanh recurrence with
             h carried in VMEM scratch, overwrite hs_buf[t] with h_t, and emit
             the final state on the last chunk.
    all v  : logits[chunk, vtile] = hs_buf @ W_out^T[:, vtile] + b_out[vtile].
    """
    c = pl.program_id(0)
    tc, bp, hp = hs_buf.shape
    vp = wih_ref.shape[0]

    @pl.when(pl.program_id(1) == 0)
    def _recurrence():
        @pl.when(c == 0)
        def _():
            h_carry[...] = h0_ref[...]            # provided initial state

        bias = bias_ref[...]                      # (1, Hp) f32  (b_ih + b_hh)

        # ---- input projection, `sub` steps at a time (bounds vreg pressure) ----
        def proj(s, carry):
            t0 = pl.multiple_of(s * sub, sub)
            tok = tok_ref[pl.ds(t0, sub)]                          # (sub, Bp, 1) i32
            iota = lax.broadcasted_iota(jnp.int32, (sub, bp, vp), 2)
            onehot = jnp.where(tok == iota, 1.0, 0.0).astype(wih_ref.dtype)
            pre = jnp.dot(onehot.reshape(sub * bp, vp), wih_ref[...],
                          preferred_element_type=jnp.float32) + bias
            hs_buf[pl.ds(t0, sub)] = pre.reshape(sub, bp, hp)
            return carry

        lax.fori_loop(0, tc // sub, proj, 0, unroll=True)

        # ---- serial recurrence: h_t = tanh(pre_t + h_{t-1} @ W_hh^T) -----------
        whh = whh_ref[...]                        # (Hp, Hp) bf16, load once

        def step(t, h):
            h_new = jnp.tanh(
                hs_buf[t]
                + jnp.dot(h.astype(whh.dtype), whh,
                          preferred_element_type=jnp.float32))
            if time_guard:                        # static: only when T was padded
                keep = (c * tc + t < t_total).astype(jnp.float32)
                h_new = keep * h_new + (1.0 - keep) * h
            hs_buf[t] = h_new                     # reuse the pre slot for h_t
            return h_new

        h_last = lax.fori_loop(0, tc, step, h_carry[...], unroll=8)
        h_carry[...] = h_last                     # carry across chunks

        @pl.when(c == pl.num_programs(0) - 1)
        def _():
            hT_ref[...] = h_last                  # write final state once

    # ---- output projection for this (chunk, vocab tile): one big MXU matmul ----
    hs = hs_buf[...].reshape(tc * bp, hp).astype(wout_ref.dtype)
    out_ref[...] = (
        jnp.dot(hs, wout_ref[...], preferred_element_type=jnp.float32)
        + bout_ref[...])


@functools.partial(jax.jit, static_argnames=("max_time_chunk", "max_vocab_tile"))
def rnn_model_forward(inputs, state, params, *, max_time_chunk=64,
                      max_vocab_tile=1024):
    """Pallas forward pass matching RNNModel.forward.

    inputs : (batch, num_steps) int32 token ids
    state  : (1, batch, hidden) float32
    returns: (logits (num_steps*batch, vocab), state (1, batch, hidden))
    """
    w_ih, w_hh, b_ih, b_hh, w_out, b_out = params
    H, V = w_ih.shape
    B, T = inputs.shape

    # Hardware-tile padding (f32: 8 sublanes x 128 lanes).  Zero padding is
    # exact: padded hidden lanes stay 0 through the tanh recurrence, padded
    # batch / time / vocab entries are sliced off at the end.
    Bp = _round_up(B, 8)
    Hp = _round_up(H, 128)
    Vp = _round_up(V, 128)

    Tc = _pick_time_chunk(T, max_time_chunk)      # time steps per chunk
    Tp = _round_up(T, Tc)
    nc = Tp // Tc
    tn = _pick_vocab_tile(Vp, max_vocab_tile)     # vocab tile of W_out^T
    nv = Vp // tn
    time_guard = (Tp != T)

    bf16 = jnp.bfloat16
    tok_pad = jnp.zeros((Tp, Bp, 1), jnp.int32).at[:T, :B, 0].set(inputs.T)
    h0_pad = jnp.zeros((Bp, Hp), jnp.float32).at[:B, :H].set(state[0])
    bias_pad = jnp.zeros((1, Hp), jnp.float32).at[0, :H].set(b_ih + b_hh)
    wih_t_pad = jnp.zeros((Vp, Hp), bf16).at[:V, :H].set(w_ih.T.astype(bf16))
    whh_t_pad = jnp.zeros((Hp, Hp), bf16).at[:H, :H].set(w_hh.T.astype(bf16))
    wout_t_pad = jnp.zeros((Hp, Vp), bf16).at[:H, :V].set(w_out.T.astype(bf16))
    bout_pad = jnp.zeros((1, Vp), jnp.float32).at[0, :V].set(b_out)

    kernel = functools.partial(_fused_rnn_kernel, t_total=T, sub=8,
                               time_guard=time_guard)

    logits_pad, hT_pad = pl.pallas_call(
        kernel,
        out_shape=(
            jax.ShapeDtypeStruct((Tp * Bp, Vp), jnp.float32),        # logits (padded)
            jax.ShapeDtypeStruct((Bp, Hp), jnp.float32),             # final hidden
        ),
        grid_spec=pltpu.PrefetchScalarGridSpec(
            num_scalar_prefetch=0,
            grid=(nc, nv),
            in_specs=[
                pl.BlockSpec((Tc, Bp, 1), lambda c, v: (c, 0, 0)),   # token ids
                pl.BlockSpec((Bp, Hp), lambda c, v: (0, 0)),         # h0 (resident)
                pl.BlockSpec((1, Hp), lambda c, v: (0, 0)),          # b_ih + b_hh
                pl.BlockSpec((Vp, Hp), lambda c, v: (0, 0)),         # W_ih^T  bf16
                pl.BlockSpec((Hp, Hp), lambda c, v: (0, 0)),         # W_hh^T  bf16
                pl.BlockSpec((Hp, tn), lambda c, v: (0, v)),         # W_out^T tile
                pl.BlockSpec((1, tn), lambda c, v: (0, v)),          # b_out tile
            ],
            out_specs=[
                pl.BlockSpec((Tc * Bp, tn), lambda c, v: (c, v)),    # logits block
                pl.BlockSpec((Bp, Hp), lambda c, v: (0, 0)),         # final state
            ],
            scratch_shapes=[
                pltpu.VMEM((Bp, Hp), jnp.float32),       # carried hidden state
                pltpu.VMEM((Tc, Bp, Hp), jnp.float32),   # pre_t, then h_t (per chunk)
            ],
        ),
        compiler_params=pltpu.CompilerParams(
            dimension_semantics=("arbitrary", "arbitrary"),   # sequential recurrence
            vmem_limit_bytes=32 * 1024 * 1024),
    )(tok_pad, h0_pad, bias_pad, wih_t_pad, whh_t_pad, wout_t_pad, bout_pad)

    logits = logits_pad.reshape(Tp, Bp, Vp)[:T, :B, :V].reshape(T * B, V)
    h_final = hT_pad[:B, :H][None]                                   # (1, B, H)
    return logits, h_final


def _reference_forward(inputs, state, params):
    """Pure-JAX reference mirroring PyTorch nn.RNN(tanh) + nn.Linear."""
    w_ih, w_hh, b_ih, b_hh, w_out, b_out = params
    V = w_ih.shape[1]
    x = jax.nn.one_hot(inputs.T, V, dtype=jnp.float32)               # (T, B, V)

    def step(h, x_t):
        h_new = jnp.tanh(x_t @ w_ih.T + b_ih + b_hh + h @ w_hh.T)
        return h_new, h_new

    h_last, ys = lax.scan(step, state[0], x)
    out = ys.reshape(-1, ys.shape[-1]) @ w_out.T + b_out
    return out, h_last[None]


def _round_weights_to_bf16(params):
    """Model the kernel's bf16 weight storage (f32 accumulation) for parity."""
    return tuple(p.astype(jnp.bfloat16).astype(jnp.float32) if p.ndim == 2 else p
                 for p in params)


def _run_case(key, vocab_size, num_hiddens, batch_size, num_steps, **kw):
    k0, k1, k2, k3, k4, k5, k6 = jax.random.split(key, 7)
    bound = float(num_hiddens) ** -0.5

    # nn.RNN(vocab_size, num_hiddens) + nn.Linear(num_hiddens, vocab_size).
    w_ih = jax.random.uniform(k0, (num_hiddens, vocab_size), jnp.float32, -bound, bound)
    w_hh = jax.random.uniform(k1, (num_hiddens, num_hiddens), jnp.float32, -bound, bound)
    b_ih = jax.random.uniform(k2, (num_hiddens,), jnp.float32, -bound, bound)
    b_hh = jax.random.uniform(k3, (num_hiddens,), jnp.float32, -bound, bound)
    w_out = jax.random.uniform(k4, (vocab_size, num_hiddens), jnp.float32, -bound, bound)
    b_out = jax.random.uniform(k5, (vocab_size,), jnp.float32, -bound, bound)
    params = (w_ih, w_hh, b_ih, b_hh, w_out, b_out)

    inputs = jax.random.randint(k6, (batch_size, num_steps), 0, vocab_size, jnp.int32)
    state0 = jnp.zeros((1, batch_size, num_hiddens), jnp.float32)    # begin_state

    out, st = rnn_model_forward(inputs, state0, params, **kw)
    jax.block_until_ready((out, st))

    assert out.shape == (num_steps * batch_size, vocab_size)
    assert st.shape == (1, batch_size, num_hiddens)

    # Parity vs. a reference using the same bf16-rounded weights (f32 math).
    ref_out, ref_st = _reference_forward(inputs, state0, _round_weights_to_bf16(params))
    assert jnp.allclose(out, ref_out, atol=2e-2, rtol=2e-2)
    assert jnp.allclose(st, ref_st, atol=2e-2, rtol=2e-2)
    # Loose sanity check vs. the full-f32 reference.
    f32_out, f32_st = _reference_forward(inputs, state0, params)
    assert jnp.allclose(out, f32_out, atol=1e-1, rtol=1e-1)
    assert jnp.allclose(st, f32_st, atol=1e-1, rtol=1e-1)


if __name__ == "__main__":
    root = jax.random.PRNGKey(0)
    # Small shapes consistent with the module (token ids in, one-hot inside).
    _run_case(root, vocab_size=32, num_hiddens=64, batch_size=4, num_steps=8)
    # Exercise multi-chunk time, padded (non-divisible) T/B/V, and vocab tiling.
    _run_case(jax.random.fold_in(root, 1), vocab_size=200, num_hiddens=128,
              batch_size=5, num_steps=20, max_time_chunk=16, max_vocab_tile=128)
    print("KERNEL_OK")
</pallas_src>

<mosaic_0001>
module attributes {stable_mosaic.version = 11 : i64} {
  func.func @_fused_rnn_kernel(%arg0: i32, %arg1: i32, %arg2: memref<8x8x1xi32, #tpu.memory_space<vmem>>, %arg3: memref<8x128xf32, #tpu.memory_space<vmem>>, %arg4: memref<1x128xf32, #tpu.memory_space<vmem>>, %arg5: memref<128x128xbf16, #tpu.memory_space<vmem>>, %arg6: memref<128x128xbf16, #tpu.memory_space<vmem>>, %arg7: memref<128x128xbf16, #tpu.memory_space<vmem>>, %arg8: memref<1x128xf32, #tpu.memory_space<vmem>>, %arg9: memref<64x128xf32, #tpu.memory_space<vmem>>, %arg10: memref<8x128xf32, #tpu.memory_space<vmem>>, %arg11: memref<8x128xf32, #tpu.memory_space<vmem>>, %arg12: memref<8x8x128xf32, #tpu.memory_space<vmem>>) attributes {dimension_semantics = [#tpu.dimension_semantics<arbitrary>, #tpu.dimension_semantics<arbitrary>], iteration_bounds = array<i64: 1, 1>, scalar_prefetch = 0 : i64, scratch_operands = 2 : i64, tpu.core_type = #tpu.core_type<tc>, window_params = [{transform_indices = @transform_0, window_bounds = array<i64: 8, 8, 1>}, {pipeline_mode = #tpu.pipeline_mode<synchronous>, transform_indices = @transform_1, window_bounds = array<i64: 8, 128>}, {pipeline_mode = #tpu.pipeline_mode<synchronous>, transform_indices = @transform_2, window_bounds = array<i64: 1, 128>}, {pipeline_mode = #tpu.pipeline_mode<synchronous>, transform_indices = @transform_3, window_bounds = array<i64: 128, 128>}, {pipeline_mode = #tpu.pipeline_mode<synchronous>, transform_indices = @transform_4, window_bounds = array<i64: 128, 128>}, {transform_indices = @transform_5, window_bounds = array<i64: 128, 128>}, {transform_indices = @transform_6, window_bounds = array<i64: 1, 128>}, {transform_indices = @transform_7, window_bounds = array<i64: 64, 128>}, {pipeline_mode = #tpu.pipeline_mode<synchronous>, transform_indices = @transform_8, window_bounds = array<i64: 8, 128>}]} {
    %c0_i32 = arith.constant 0 : i32
    %0 = arith.cmpi eq, %arg1, %c0_i32 : i32
    %1 = arith.extui %0 : i1 to i32
    %c0_i32_0 = arith.constant 0 : i32
    %2 = arith.cmpi ne, %1, %c0_i32_0 : i32
    scf.if %2 {
      %c0_i32_9 = arith.constant 0 : i32
      %12 = arith.cmpi eq, %arg0, %c0_i32_9 : i32
      %13 = arith.extui %12 : i1 to i32
      %c0_i32_10 = arith.constant 0 : i32
      %14 = arith.cmpi ne, %13, %c0_i32_10 : i32
      scf.if %14 {
        %c0_74 = arith.constant 0 : index
        %c0_75 = arith.constant 0 : index
        %129 = vector.load %arg3[%c0_74, %c0_75] : memref<8x128xf32, #tpu.memory_space<vmem>>, vector<8x128xf32>
        %c0_76 = arith.constant 0 : index
        %c0_77 = arith.constant 0 : index
        %130 = vector.load %arg11[%c0_76, %c0_77] : memref<8x128xf32, #tpu.memory_space<vmem>>, vector<8x128xf32>
        tpu.vector_store %arg11[%c0_76, %c0_77], %129 {strides = array<i32>} : memref<8x128xf32, #tpu.memory_space<vmem>>, vector<8x128xf32>,
      } else {
      }
      %c0_11 = arith.constant 0 : index
      %c0_12 = arith.constant 0 : index
      %15 = vector.load %arg4[%c0_11, %c0_12] : memref<1x128xf32, #tpu.memory_space<vmem>>, vector<1x128xf32>
      %c0_i32_13 = arith.constant 0 : i32
      %c8_i32 = arith.constant 8 : i32
      %16 = arith.muli %c0_i32_13, %c8_i32 : i32
      %17 = tpu.assume_multiple %16, 8 : i32
      %18 = arith.index_cast %17 : i32 to index
      %c0_14 = arith.constant 0 : index
      %c0_15 = arith.constant 0 : index
      %19 = vector.load %arg2[%18, %c0_14, %c0_15] : memref<8x8x1xi32, #tpu.memory_space<vmem>>, vector<8x8x1xi32>
      %20 = tpu.iota {dimensions = array<i32: 2>} : vector<8x8x128xi32>
      %21 = vector.broadcast %19 : vector<8x8x1xi32> to vector<8x8x128xi32>
      %22 = arith.cmpi eq, %21, %20 : vector<8x8x128xi32>
      %cst_16 = arith.constant 1.000000e+00 : f32
      %cst_17 = arith.constant 0.000000e+00 : f32
      %23 = vector.broadcast %cst_16 : f32 to vector<8x8x128xf32>
      %24 = vector.broadcast %cst_17 : f32 to vector<8x8x128xf32>
      %25 = arith.select %22, %23, %24 : vector<8x8x128xi1>, vector<8x8x128xf32>
      %26 = arith.truncf %25 : vector<8x8x128xf32> to vector<8x8x128xbf16>
      %27 = vector.shape_cast %26 : vector<8x8x128xbf16> to vector<64x128xbf16>
      %c0_18 = arith.constant 0 : index
      %c0_19 = arith.constant 0 : index
      %28 = vector.load %arg5[%c0_18, %c0_19] : memref<128x128xbf16, #tpu.memory_space<vmem>>, vector<128x128xbf16>
      %cst_20 = arith.constant dense<0.000000e+00> : vector<64x128xf32>
      %29 = tpu.matmul %27, %28, %cst_20 {dimension_numbers = #tpu.dot_dimension_numbers<[1], [0], [0], [1], [0, 0, 1, 1], [], []>} : vector<64x128xbf16>, vector<128x128xbf16>, vector<64x128xf32> -> vector<64x128xf32>
      %30 = vector.broadcast %15 : vector<1x128xf32> to vector<64x128xf32>
      %31 = arith.addf %29, %30 : vector<64x128xf32>
      %32 = vector.shape_cast %31 : vector<64x128xf32> to vector<8x8x128xf32>
      %33 = arith.index_cast %17 : i32 to index
      %c0_21 = arith.constant 0 : index
      %c0_22 = arith.constant 0 : index
      %34 = vector.load %arg12[%33, %c0_21, %c0_22] : memref<8x8x128xf32, #tpu.memory_space<vmem>>, vector<8x8x128xf32>
      tpu.vector_store %arg12[%33, %c0_21, %c0_22], %32 {strides = array<i32>} : memref<8x8x128xf32, #tpu.memory_space<vmem>>, vector<8x8x128xf32>,
      %c1_i32 = arith.constant 1 : i32
      %c0_23 = arith.constant 0 : index
      %c0_24 = arith.constant 0 : index
      %35 = vector.load %arg6[%c0_23, %c0_24] : memref<128x128xbf16, #tpu.memory_space<vmem>>, vector<128x128xbf16>
      %c0_25 = arith.constant 0 : index
      %c0_26 = arith.constant 0 : index
      %36 = vector.load %arg11[%c0_25, %c0_26] : memref<8x128xf32, #tpu.memory_space<vmem>>, vector<8x128xf32>
      %c0_i32_27 = arith.constant 0 : i32
      %37 = arith.index_cast %c0_i32_27 : i32 to index
      %c0_28 = arith.constant 0 : index
      %c0_29 = arith.constant 0 : index
      %38 = vector.load %arg12[%37, %c0_28, %c0_29] : memref<8x8x128xf32, #tpu.memory_space<vmem>>, vector<1x8x128xf32>
      %39 = vector.shape_cast %38 : vector<1x8x128xf32> to vector<8x128xf32>
      %40 = arith.truncf %36 : vector<8x128xf32> to vector<8x128xbf16>
      %cst_30 = arith.constant dense<0.000000e+00> : vector<8x128xf32>
      %41 = tpu.matmul %40, %35, %cst_30 {dimension_numbers = #tpu.dot_dimension_numbers<[1], [0], [0], [1], [0, 0, 1, 1], [], []>} : vector<8x128xbf16>, vector<128x128xbf16>, vector<8x128xf32> -> vector<8x128xf32>
      %42 = arith.addf %39, %41 : vector<8x128xf32>
      %43 = math.tanh %42 : vector<8x128xf32>
      %44 = arith.index_cast %c0_i32_27 : i32 to index
      %c0_31 = arith.constant 0 : index
      %c0_32 = arith.constant 0 : index
      %45 = vector.load %arg12[%44, %c0_31, %c0_32] : memref<8x8x128xf32, #tpu.memory_space<vmem>>, vector<1x8x128xf32>
      %46 = vector.shape_cast %45 : vector<1x8x128xf32> to vector<8x128xf32>
      %47 = vector.shape_cast %43 : vector<8x128xf32> to vector<1x8x128xf32>
      tpu.vector_store %arg12[%44, %c0_31, %c0_32], %47 {strides = array<i32>} : memref<8x8x128xf32, #tpu.memory_space<vmem>>, vector<1x8x128xf32>,
      %c1_i32_33 = arith.constant 1 : i32
      %48 = arith.index_cast %c1_i32_33 : i32 to index
      %c0_34 = arith.constant 0 : index
      %c0_35 = arith.constant 0 : index
      %49 = vector.load %arg12[%48, %c0_34, %c0_35] : memref<8x8x128xf32, #tpu.memory_space<vmem>>, vector<1x8x128xf32>
      %50 = vector.shape_cast %49 : vector<1x8x128xf32> to vector<8x128xf32>
      %51 = arith.truncf %43 : vector<8x128xf32> to vector<8x128xbf16>
      %cst_36 = arith.constant dense<0.000000e+00> : vector<8x128xf32>
      %52 = tpu.matmul %51, %35, %cst_36 {dimension_numbers = #tpu.dot_dimension_numbers<[1], [0], [0], [1], [0, 0, 1, 1], [], []>} : vector<8x128xbf16>, vector<128x128xbf16>, vector<8x128xf32> -> vector<8x128xf32>
      %53 = arith.addf %50, %52 : vector<8x128xf32>
      %54 = math.tanh %53 : vector<8x128xf32>
      %55 = arith.index_cast %c1_i32_33 : i32 to index
      %c0_37 = arith.constant 0 : index
      %c0_38 = arith.constant 0 : index
      %56 = vector.load %arg12[%55, %c0_37, %c0_38] : memref<8x8x128xf32, #tpu.memory_space<vmem>>, vector<1x8x128xf32>
      %57 = vector.shape_cast %56 : vector<1x8x128xf32> to vector<8x128xf32>
      %58 = vector.shape_cast %54 : vector<8x128xf32> to vector<1x8x128xf32>
      tpu.vector_store %arg12[%55, %c0_37, %c0_38], %58 {strides = array<i32>} : memref<8x8x128xf32, #tpu.memory_space<vmem>>, vector<1x8x128xf32>,
      %c2_i32 = arith.constant 2 : i32
      %59 = arith.index_cast %c2_i32 : i32 to index
      %c0_39 = arith.constant 0 : index
      %c0_40 = arith.constant 0 : index
      %60 = vector.load %arg12[%59, %c0_39, %c0_40] : memref<8x8x128xf32, #tpu.memory_space<vmem>>, vector<1x8x128xf32>
      %61 = vector.shape_cast %60 : vector<1x8x128xf32> to vector<8x128xf32>
      %62 = arith.truncf %54 : vector<8x128xf32> to vector<8x128xbf16>
      %cst_41 = arith.constant dense<0.000000e+00> : vector<8x128xf32>
      %63 = tpu.matmul %62, %35, %cst_41 {dimension_numbers = #tpu.dot_dimension_numbers<[1], [0], [0], [1], [0, 0, 1, 1], [], []>} : vector<8x128xbf16>, vector<128x128xbf16>, vector<8x128xf32> -> vector<8x128xf32>
      %64 = arith.addf %61, %63 : vector<8x128xf32>
      %65 = math.tanh %64 : vector<8x128xf32>
      %66 = arith.index_cast %c2_i32 : i32 to index
      %c0_42 = arith.constant 0 : index
      %c0_43 = arith.constant 0 : index
      %67 = vector.load %arg12[%66, %c0_42, %c0_43] : memref<8x8x128xf32, #tpu.memory_space<vmem>>, vector<1x8x128xf32>
      %68 = vector.shape_cast %67 : vector<1x8x128xf32> to vector<8x128xf32>
      %69 = vector.shape_cast %65 : vector<8x128xf32> to vector<1x8x128xf32>
      tpu.vector_store %arg12[%66, %c0_42, %c0_43], %69 {strides = array<i32>} : memref<8x8x128xf32, #tpu.memory_space<vmem>>, vector<1x8x128xf32>,
      %c3_i32 = arith.constant 3 : i32
      %70 = arith.index_cast %c3_i32 : i32 to index
      %c0_44 = arith.constant 0 : index
      %c0_45 = arith.constant 0 : index
      %71 = vector.load %arg12[%70, %c0_44, %c0_45] : memref<8x8x128xf32, #tpu.memory_space<vmem>>, vector<1x8x128xf32>
      %72 = vector.shape_cast %71 : vector<1x8x128xf32> to vector<8x128xf32>
      %73 = arith.truncf %65 : vector<8x128xf32> to vector<8x128xbf16>
      %cst_46 = arith.constant dense<0.000000e+00> : vector<8x128xf32>
      %74 = tpu.matmul %73, %35, %cst_46 {dimension_numbers = #tpu.dot_dimension_numbers<[1], [0], [0], [1], [0, 0, 1, 1], [], []>} : vector<8x128xbf16>, vector<128x128xbf16>, vector<8x128xf32> -> vector<8x128xf32>
      %75 = arith.addf %72, %74 : vector<8x128xf32>
      %76 = math.tanh %75 : vector<8x128xf32>
      %77 = arith.index_cast %c3_i32 : i32 to index
      %c0_47 = arith.constant 0 : index
      %c0_48 = arith.constant 0 : index
      %78 = vector.load %arg12[%77, %c0_47, %c0_48] : memref<8x8x128xf32, #tpu.memory_space<vmem>>, vector<1x8x128xf32>
      %79 = vector.shape_cast %78 : vector<1x8x128xf32> to vector<8x128xf32>
      %80 = vector.shape_cast %76 : vector<8x128xf32> to vector<1x8x128xf32>
      tpu.vector_store %arg12[%77, %c0_47, %c0_48], %80 {strides = array<i32>} : memref<8x8x128xf32, #tpu.memory_space<vmem>>, vector<1x8x128xf32>,
      %c4_i32 = arith.constant 4 : i32
      %81 = arith.index_cast %c4_i32 : i32 to index
      %c0_49 = arith.constant 0 : index
      %c0_50 = arith.constant 0 : index
      %82 = vector.load %arg12[%81, %c0_49, %c0_50] : memref<8x8x128xf32, #tpu.memory_space<vmem>>, vector<1x8x128xf32>
      %83 = vector.shape_cast %82 : vector<1x8x128xf32> to vector<8x128xf32>
      %84 = arith.truncf %76 : vector<8x128xf32> to vector<8x128xbf16>
      %cst_51 = arith.constant dense<0.000000e+00> : vector<8x128xf32>
      %85 = tpu.matmul %84, %35, %cst_51 {dimension_numbers = #tpu.dot_dimension_numbers<[1], [0], [0], [1], [0, 0, 1, 1], [], []>} : vector<8x128xbf16>, vector<128x128xbf16>, vector<8x128xf32> -> vector<8x128xf32>
      %86 = arith.addf %83, %85 : vector<8x128xf32>
      %87 = math.tanh %86 : vector<8x128xf32>
      %88 = arith.index_cast %c4_i32 : i32 to index
      %c0_52 = arith.constant 0 : index
      %c0_53 = arith.constant 0 : index
      %89 = vector.load %arg12[%88, %c0_52, %c0_53] : memref<8x8x128xf32, #tpu.memory_space<vmem>>, vector<1x8x128xf32>
      %90 = vector.shape_cast %89 : vector<1x8x128xf32> to vector<8x128xf32>
      %91 = vector.shape_cast %87 : vector<8x128xf32> to vector<1x8x128xf32>
      tpu.vector_store %arg12[%88, %c0_52, %c0_53], %91 {strides = array<i32>} : memref<8x8x128xf32, #tpu.memory_space<vmem>>, vector<1x8x128xf32>,
      %c5_i32 = arith.constant 5 : i32
      %92 = arith.index_cast %c5_i32 : i32 to index
      %c0_54 = arith.constant 0 : index
      %c0_55 = arith.constant 0 : index
      %93 = vector.load %arg12[%92, %c0_54, %c0_55] : memref<8x8x128xf32, #tpu.memory_space<vmem>>, vector<1x8x128xf32>
      %94 = vector.shape_cast %93 : vector<1x8x128xf32> to vector<8x128xf32>
      %95 = arith.truncf %87 : vector<8x128xf32> to vector<8x128xbf16>
      %cst_56 = arith.constant dense<0.000000e+00> : vector<8x128xf32>
      %96 = tpu.matmul %95, %35, %cst_56 {dimension_numbers = #tpu.dot_dimension_numbers<[1], [0], [0], [1], [0, 0, 1, 1], [], []>} : vector<8x128xbf16>, vector<128x128xbf16>, vector<8x128xf32> -> vector<8x128xf32>
      %97 = arith.addf %94, %96 : vector<8x128xf32>
      %98 = math.tanh %97 : vector<8x128xf32>
      %99 = arith.index_cast %c5_i32 : i32 to index
      %c0_57 = arith.constant 0 : index
      %c0_58 = arith.constant 0 : index
      %100 = vector.load %arg12[%99, %c0_57, %c0_58] : memref<8x8x128xf32, #tpu.memory_space<vmem>>, vector<1x8x128xf32>
      %101 = vector.shape_cast %100 : vector<1x8x128xf32> to vector<8x128xf32>
      %102 = vector.shape_cast %98 : vector<8x128xf32> to vector<1x8x128xf32>
      tpu.vector_store %arg12[%99, %c0_57, %c0_58], %102 {strides = array<i32>} : memref<8x8x128xf32, #tpu.memory_space<vmem>>, vector<1x8x128xf32>,
      %c6_i32 = arith.constant 6 : i32
      %103 = arith.index_cast %c6_i32 : i32 to index
      %c0_59 = arith.constant 0 : index
      %c0_60 = arith.constant 0 : index
      %104 = vector.load %arg12[%103, %c0_59, %c0_60] : memref<8x8x128xf32, #tpu.memory_space<vmem>>, vector<1x8x128xf32>
      %105 = vector.shape_cast %104 : vector<1x8x128xf32> to vector<8x128xf32>
      %106 = arith.truncf %98 : vector<8x128xf32> to vector<8x128xbf16>
      %cst_61 = arith.constant dense<0.000000e+00> : vector<8x128xf32>
      %107 = tpu.matmul %106, %35, %cst_61 {dimension_numbers = #tpu.dot_dimension_numbers<[1], [0], [0], [1], [0, 0, 1, 1], [], []>} : vector<8x128xbf16>, vector<128x128xbf16>, vector<8x128xf32> -> vector<8x128xf32>
      %108 = arith.addf %105, %107 : vector<8x128xf32>
      %109 = math.tanh %108 : vector<8x128xf32>
      %110 = arith.index_cast %c6_i32 : i32 to index
      %c0_62 = arith.constant 0 : index
      %c0_63 = arith.constant 0 : index
      %111 = vector.load %arg12[%110, %c0_62, %c0_63] : memref<8x8x128xf32, #tpu.memory_space<vmem>>, vector<1x8x128xf32>
      %112 = vector.shape_cast %111 : vector<1x8x128xf32> to vector<8x128xf32>
      %113 = vector.shape_cast %109 : vector<8x128xf32> to vector<1x8x128xf32>
      tpu.vector_store %arg12[%110, %c0_62, %c0_63], %113 {strides = array<i32>} : memref<8x8x128xf32, #tpu.memory_space<vmem>>, vector<1x8x128xf32>,
      %c7_i32 = arith.constant 7 : i32
      %114 = arith.index_cast %c7_i32 : i32 to index
      %c0_64 = arith.constant 0 : index
      %c0_65 = arith.constant 0 : index
      %115 = vector.load %arg12[%114, %c0_64, %c0_65] : memref<8x8x128xf32, #tpu.memory_space<vmem>>, vector<1x8x128xf32>
      %116 = vector.shape_cast %115 : vector<1x8x128xf32> to vector<8x128xf32>
      %117 = arith.truncf %109 : vector<8x128xf32> to vector<8x128xbf16>
      %cst_66 = arith.constant dense<0.000000e+00> : vector<8x128xf32>
      %118 = tpu.matmul %117, %35, %cst_66 {dimension_numbers = #tpu.dot_dimension_numbers<[1], [0], [0], [1], [0, 0, 1, 1], [], []>} : vector<8x128xbf16>, vector<128x128xbf16>, vector<8x128xf32> -> vector<8x128xf32>
      %119 = arith.addf %116, %118 : vector<8x128xf32>
      %120 = math.tanh %119 : vector<8x128xf32>
      %121 = arith.index_cast %c7_i32 : i32 to index
      %c0_67 = arith.constant 0 : index
      %c0_68 = arith.constant 0 : index
      %122 = vector.load %arg12[%121, %c0_67, %c0_68] : memref<8x8x128xf32, #tpu.memory_space<vmem>>, vector<1x8x128xf32>
      %123 = vector.shape_cast %122 : vector<1x8x128xf32> to vector<8x128xf32>
      %124 = vector.shape_cast %120 : vector<8x128xf32> to vector<1x8x128xf32>
      tpu.vector_store %arg12[%121, %c0_67, %c0_68], %124 {strides = array<i32>} : memref<8x8x128xf32, #tpu.memory_space<vmem>>, vector<1x8x128xf32>,
      %c8_i32_69 = arith.constant 8 : i32
      %c0_70 = arith.constant 0 : index
      %c0_71 = arith.constant 0 : index
      %125 = vector.load %arg11[%c0_70, %c0_71] : memref<8x128xf32, #tpu.memory_space<vmem>>, vector<8x128xf32>
      tpu.vector_store %arg11[%c0_70, %c0_71], %120 {strides = array<i32>} : memref<8x128xf32, #tpu.memory_space<vmem>>, vector<8x128xf32>,
      %c0_i32_72 = arith.constant 0 : i32
      %126 = arith.cmpi eq, %arg0, %c0_i32_72 : i32
      %127 = arith.extui %126 : i1 to i32
      %c0_i32_73 = arith.constant 0 : i32
      %128 = arith.cmpi ne, %127, %c0_i32_73 : i32
      scf.if %128 {
        %c0_74 = arith.constant 0 : index
        %c0_75 = arith.constant 0 : index
        %129 = vector.load %arg10[%c0_74, %c0_75] : memref<8x128xf32, #tpu.memory_space<vmem>>, vector<8x128xf32>
        tpu.vector_store %arg10[%c0_74, %c0_75], %120 {strides = array<i32>} : memref<8x128xf32, #tpu.memory_space<vmem>>, vector<8x128xf32>,
      } else {
      }
    } else {
    }
    %c0 = arith.constant 0 : index
    %c0_1 = arith.constant 0 : index
    %c0_2 = arith.constant 0 : index
    %3 = vector.load %arg12[%c0, %c0_1, %c0_2] : memref<8x8x128xf32, #tpu.memory_space<vmem>>, vector<8x8x128xf32>
    %4 = vector.shape_cast %3 : vector<8x8x128xf32> to vector<64x128xf32>
    %5 = arith.truncf %4 : vector<64x128xf32> to vector<64x128xbf16>
    %c0_3 = arith.constant 0 : index
    %c0_4 = arith.constant 0 : index
    %6 = vector.load %arg7[%c0_3, %c0_4] : memref<128x128xbf16, #tpu.memory_space<vmem>>, vector<128x128xbf16>
    %cst = arith.constant dense<0.000000e+00> : vector<64x128xf32>
    %7 = tpu.matmul %5, %6, %cst {dimension_numbers = #tpu.dot_dimension_numbers<[1], [0], [0], [1], [0, 0, 1, 1], [], []>} : vector<64x128xbf16>, vector<128x128xbf16>, vector<64x128xf32> -> vector<64x128xf32>
    %c0_5 = arith.constant 0 : index
    %c0_6 = arith.constant 0 : index
    %8 = vector.load %arg8[%c0_5, %c0_6] : memref<1x128xf32, #tpu.memory_space<vmem>>, vector<1x128xf32>
    %9 = vector.broadcast %8 : vector<1x128xf32> to vector<64x128xf32>
    %10 = arith.addf %7, %9 : vector<64x128xf32>
    %c0_7 = arith.constant 0 : index
    %c0_8 = arith.constant 0 : index
    %11 = vector.load %arg9[%c0_7, %c0_8] : memref<64x128xf32, #tpu.memory_space<vmem>>, vector<64x128xf32>
    tpu.vector_store %arg9[%c0_7, %c0_8], %10 {strides = array<i32>} : memref<64x128xf32, #tpu.memory_space<vmem>>, vector<64x128xf32>,
    return
  }
  func.func @transform_0(%arg0: i32, %arg1: i32) -> (i32, i32, i32) {
    %c0_i32 = arith.constant 0 : i32
    %c0_i32_0 = arith.constant 0 : i32
    %c0_i32_1 = arith.constant 0 : i32
    return %arg0, %c0_i32, %c0_i32_0 : i32, i32, i32
  }
  func.func @transform_1(%arg0: i32, %arg1: i32) -> (i32, i32) {
    %c0_i32 = arith.constant 0 : i32
    %c0_i32_0 = arith.constant 0 : i32
    %c0_i32_1 = arith.constant 0 : i32
    return %c0_i32, %c0_i32_0 : i32, i32
  }
  func.func @transform_2(%arg0: i32, %arg1: i32) -> (i32, i32) {
    %c0_i32 = arith.constant 0 : i32
    %c0_i32_0 = arith.constant 0 : i32
    %c0_i32_1 = arith.constant 0 : i32
    return %c0_i32, %c0_i32_0 : i32, i32
  }
  func.func @transform_3(%arg0: i32, %arg1: i32) -> (i32, i32) {
    %c0_i32 = arith.constant 0 : i32
    %c0_i32_0 = arith.constant 0 : i32
    %c0_i32_1 = arith.constant 0 : i32
    return %c0_i32, %c0_i32_0 : i32, i32
  }
  func.func @transform_4(%arg0: i32, %arg1: i32) -> (i32, i32) {
    %c0_i32 = arith.constant 0 : i32
    %c0_i32_0 = arith.constant 0 : i32
    %c0_i32_1 = arith.constant 0 : i32
    return %c0_i32, %c0_i32_0 : i32, i32
  }
  func.func @transform_5(%arg0: i32, %arg1: i32) -> (i32, i32) {
    %c0_i32 = arith.constant 0 : i32
    %c0_i32_0 = arith.constant 0 : i32
    return %c0_i32, %arg1 : i32, i32
  }
  func.func @transform_6(%arg0: i32, %arg1: i32) -> (i32, i32) {
    %c0_i32 = arith.constant 0 : i32
    %c0_i32_0 = arith.constant 0 : i32
    return %c0_i32, %arg1 : i32, i32
  }
  func.func @transform_7(%arg0: i32, %arg1: i32) -> (i32, i32) {
    %c0_i32 = arith.constant 0 : i32
    return %arg0, %arg1 : i32, i32
  }
  func.func @transform_8(%arg0: i32, %arg1: i32) -> (i32, i32) {
    %c0_i32 = arith.constant 0 : i32
    %c0_i32_0 = arith.constant 0 : i32
    %c0_i32_1 = arith.constant 0 : i32
    return %c0_i32, %c0_i32_0 : i32, i32
  }
}

</mosaic_0001>

<bundles_post_ra>
// kernel: rnn_model_forward.1
= control target key start
LH: loop header
LB: loop body
LE: loop exit
PB: predicated region body
PF: predicated region fallthrough
CT: control target
= control target key end

     0   :  { %v1261_v0 = vmov 0   ;;  %v1262_v5 = vmov 0.0   ;;  %vm1263_vm0 = vmmov 0   ;;  %v50_v28 = vlaneseq  ;;  %s1640_s0 = inlined_call_operand.vmem [shape: s32[8,8,1], index: 0, kind: input, shape index: {}]   ;;  %s1641_s3 = inlined_call_operand.vmem [shape: bf16[128,128], index: 3, kind: input, shape index: {}]   ;;  %s1642_s4 = inlined_call_operand.vmem [shape: bf16[128,128], index: 4, kind: input, shape index: {}]   ;;  %s1643_s1 = inlined_call_operand.vmem [shape: f32[8,128], index: 1, kind: input, shape index: {}]   ;;  %s1644_s2 = inlined_call_operand.vmem [shape: f32[1,128], index: 2, kind: input, shape index: {}]   ;;  %s1645_s5 = inlined_call_operand.vmem [shape: bf16[128,128], index: 5, kind: input, shape index: {}]   ;;  %s1646_s6 = inlined_call_operand.vmem [shape: f32[1,128], index: 6, kind: input, shape index: {}]   ;;  %s1647_s7 = inlined_call_operand.vmem [shape: f32[64,128], index: 7, kind: output, shape index: {0}]   ;;  %s1648_s8 = inlined_call_operand.vmem [shape: f32[8,128], index: 8, kind: output, shape index: {1}]  }
   0x1   :  { %1220 = vset.pattern.permute.xlu1 %v1261_v0  ;;  %1219 = vset.pattern.permute.xlu0 %v1261_v0  ;;  %v44_v1 = vld [vmem:[%s1640_s0 + $0x10] sm:$0xff]  ;;  %v42_v2 = vld [vmem:[%s1640_s0] sm:$0xff]  ;;  %v45_v3 = vld [vmem:[%s1640_s0 + $0x18] sm:$0xff]  ;;  %v1264_v34 = vmov 1.0|1.0  }
   0x2   :  { %59 = vperm.xlu1 %1220, %v44_v1   ;;  %53 = vperm.xlu0 %1219, %v42_v2   ;;  %v43_v4 = vld [vmem:[%s1640_s0 + $0x8] sm:$0xff]  ;;  %v1221_v6 = vld [vmem:[%s1641_s3] sm:$0xff]   ;;  %v49_v12 = vld [vmem:[%s1640_s0 + $0x38] sm:$0xff]  ;;  %v51_v31 = vand.u32 127, %v50_v28 }
   0x3   :  { %1031 = vmatprep.subr.bf16.mxu1 %v1262_v5  ;;  %v47_v7 = vld [vmem:[%s1640_s0 + $0x28] sm:$0xff]  ;;  %v46_v8 = vld [vmem:[%s1640_s0 + $0x20] sm:$0xff]  ;;  %1007 = vmatprep.subr.bf16.mxu0 %v1221_v6  ;;  %v1225_v13 = vld [vmem:[%s1641_s3 + $0x10] sm:$0xff]  }
   0x4   :  { %v1335_v9 = vld [vmem:[%s1642_s4] sm:$0xff]   ;;  %v1223_v10 = vld [vmem:[%s1641_s3 + $0x8] sm:$0xff]   ;;  %1008 = vmatpush3.bf16.msra.mxu0 %v1221_v6  ;;  %1047 = vmatprep.mubr.msk.bf16.mxu1 %vm1263_vm0, %v1262_v5  ;;  %v48_v14 = vld [vmem:[%s1640_s0 + $0x30] sm:$0xff] }
   0x5   :  { %1032 = vmatpush3.bf16.msra.mxu1 %v1335_v9  ;;  %v1344_v11 = vld [vmem:[%s1642_s4 + $0x8] sm:$0xff]   ;;  %1009 = vmatprep.subr.bf16.mxu0 %v1223_v10  ;;  %v1362_v15 = vld [vmem:[%s1642_s4 + $0x10] sm:$0xff]   ;;  %v1227_v16 = vld [vmem:[%s1641_s3 + $0x18] sm:$0xff]  }
   0x6   :  { %62 = vperm.xlu1 %1220, %v45_v3   ;;  %56 = vperm.xlu0 %1219, %v43_v4   ;;  %v1372_v17 = vld [vmem:[%s1642_s4 + $0x18] sm:$0xff]   ;;  %v1229_v18 = vld [vmem:[%s1641_s3 + $0x20] sm:$0xff]   ;;  %v1231_v20 = vld [vmem:[%s1641_s3 + $0x28] sm:$0xff]  }
   0x7   :  { %1033 = vmatprep.subr.bf16.mxu1 %v1262_v5  ;;  %v1382_v19 = vld [vmem:[%s1642_s4 + $0x20] sm:$0xff]   ;;  %v1392_v21 = vld [vmem:[%s1642_s4 + $0x28] sm:$0xff]   ;;  %v1233_v22 = vld [vmem:[%s1641_s3 + $0x30] sm:$0xff]  }
   0x8   :  { %1010 = vmatpush3.bf16.msra.mxu0 %v1223_v10  ;;  %v1402_v23 = vld [vmem:[%s1642_s4 + $0x30] sm:$0xff]   ;;  %v1235_v24 = vld [vmem:[%s1641_s3 + $0x38] sm:$0xff]   ;;  %v37_v26 = vld [vmem:[%s1643_s1] sm:$0xff] }
   0x9   :  { %1034 = vmatpush3.bf16.msra.mxu1 %v1344_v11  ;;  %1011 = vmatprep.subr.bf16.mxu0 %v1225_v13  ;;  %v1412_v25 = vld [vmem:[%s1642_s4 + $0x38] sm:$0xff]   ;;  %v286_v27 = vpack.c.bf16 %v37_v26, %v37_v26  ;;  %v869_v43 = vld [vmem:[%s1644_s2] ss:$0 sm:$0xff] }
   0xa   :  { %68 = vperm.xlu1 %1220, %v47_v7   ;;  %65 = vperm.xlu0 %1219, %v46_v8  }
   0xb   :  { %1035 = vmatprep.subr.bf16.mxu1 %v1262_v5 }
   0xc   :  { %1012 = vmatpush3.bf16.msra.mxu0 %v1225_v13 }
   0xd   :  { %1036 = vmatpush3.bf16.msra.mxu1 %v1362_v15  ;;  %1013 = vmatprep.subr.bf16.mxu0 %v1227_v16 }
   0xe   :  { %74 = vperm.xlu1 %1220, %v49_v12   ;;  %71 = vperm.xlu0 %1219, %v48_v14  }
   0xf   :  { %1037 = vmatprep.subr.bf16.mxu1 %v1262_v5 }
  0x10   :  { %1014 = vmatpush3.bf16.msra.mxu0 %v1227_v16 }
  0x11   :  { %1038 = vmatpush3.bf16.msra.mxu1 %v1372_v17  ;;  %1015 = vmatprep.subr.bf16.mxu0 %v1229_v18 }
  0x12   :  { %1039 = vmatprep.subr.bf16.mxu1 %v1262_v5 }
  0x14   :  { %1016 = vmatpush3.bf16.msra.mxu0 %v1229_v18 }
  0x15   :  { %1040 = vmatpush3.bf16.msra.mxu1 %v1382_v19  ;;  %1017 = vmatprep.subr.bf16.mxu0 %v1231_v20 }
  0x16   :  { %1041 = vmatprep.subr.bf16.mxu1 %v1262_v5 }
  0x18   :  { %1018 = vmatpush3.bf16.msra.mxu0 %v1231_v20 }
  0x19   :  { %1042 = vmatpush3.bf16.msra.mxu1 %v1392_v21  ;;  %1019 = vmatprep.subr.bf16.mxu0 %v1233_v22 }
  0x1a   :  { %1043 = vmatprep.subr.bf16.mxu1 %v1262_v5 }
  0x1c   :  { %1020 = vmatpush3.bf16.msra.mxu0 %v1233_v22 }
  0x1d   :  { %1044 = vmatpush3.bf16.msra.mxu1 %v1402_v23  ;;  %1021 = vmatprep.subr.bf16.mxu0 %v1235_v24 }
  0x1e   :  { %1045 = vmatprep.subr.bf16.mxu1 %v1262_v5 }
  0x20   :  { %1022 = vmatpush3.bf16.msra.mxu0 %v1235_v24 }
  0x21   :  { %1046 = vmatpush3.bf16.msra.mxu1 %v1412_v25  ;;  %1051 = vmatprep.subr.bf16.mxu0 %v1262_v5 }
  0x22   :  { %1071 = vmatprep.subr.bf16.mxu1 %v1262_v5 }
  0x24   :  { %1048 = vmatmul.mubr.bf16.vlgmr.msra.gmra.mrb[0].mxu1 %v286_v27 }
  0x25   :  { %1072 = vmatpush3.bf16.msra.mxu1 %v1335_v9  ;;  %1087 = vmatprep.mubr.msk.bf16.mxu1 %vm1263_vm0, %v1262_v5 }
  0x26   :  { %1073 = vmatprep.subr.bf16.mxu1 %v1262_v5 }
  0x29   :  { %1074 = vmatpush3.bf16.msra.mxu1 %v1344_v11 }
  0x2a   :  { %1075 = vmatprep.subr.bf16.mxu1 %v1262_v5 }
  0x2d   :  { %1076 = vmatpush3.bf16.msra.mxu1 %v1362_v15 }
  0x2e   :  { %1077 = vmatprep.subr.bf16.mxu1 %v1262_v5 }
  0x31   :  { %1078 = vmatpush3.bf16.msra.mxu1 %v1372_v17 }
  0x32   :  { %1079 = vmatprep.subr.bf16.mxu1 %v1262_v5 }
  0x35   :  { %1080 = vmatpush3.bf16.msra.mxu1 %v1382_v19 }
  0x36   :  { %1081 = vmatprep.subr.bf16.mxu1 %v1262_v5 }
  0x39   :  { %1082 = vmatpush3.bf16.msra.mxu1 %v1392_v21 }
  0x3a   :  { %1083 = vmatprep.subr.bf16.mxu1 %v1262_v5 }
  0x3d   :  { %1084 = vmatpush3.bf16.msra.mxu1 %v1402_v23 }
  0x3e   :  { %1085 = vmatprep.subr.bf16.mxu1 %v1262_v5 }
  0x41   :  { %1086 = vmatpush3.bf16.msra.mxu1 %v1412_v25 }
  0x42   :  { %1111 = vmatprep.subr.bf16.mxu1 %v1262_v5 }
  0x81   :  { %v60_v29 = vpop.permute.xlu1 %59  ;;  %v54_v30 = vpop.permute.xlu0 %53 }
  0x82   :  { %vm78_vm1 = vcmp.eq.s32.totalorder %v60_v29, %v51_v31  ;;  %vm76_vm4 = vcmp.eq.s32.totalorder %v54_v30, %v51_v31 }
  0x85   :  { %v63_v32 = vpop.permute.xlu1 %62  ;;  %v57_v33 = vpop.permute.xlu0 %56 }
  0x86   :  { %vm79_vm2 = vcmp.eq.s32.totalorder %v63_v32, %v51_v31  ;;  %vm77_vm3 = vcmp.eq.s32.totalorder %v57_v33, %v51_v31 }
  0x87   :  { %vm905_vm5 = vmpackc.low %vm79_vm2, %vm78_vm1 }
  0x88   :  { %vm903_vm6 = vmpackc.low %vm77_vm3, %vm76_vm4 }
  0x89   :  { %1023 = vmatprep.mubr.msk.bf16.mxu0 %vm903_vm6, %v1264_v34  ;;  %v69_v35 = vpop.permute.xlu1 %68  ;;  %v66_v36 = vpop.permute.xlu0 %65 }
  0x8a   :  { %vm81_vm7 = vcmp.eq.s32.totalorder %v69_v35, %v51_v31  ;;  %1024 = vmatmul.mubr.msk.bf16.vlgmr.msra.gmra.mrb[0].mxu0 %vm905_vm5, %v1264_v34  ;;  %vm80_vm8 = vcmp.eq.s32.totalorder %v66_v36, %v51_v31 }
  0x8b   :  { %vm907_vm9 = vmpackc.low %vm81_vm7, %vm80_vm8  ;;  %1052 = vmatpush3.bf16.msra.mxu0 %v1335_v9 }
  0x8c   :  { %1027 = vmatprep.mubr.msk.bf16.mxu0 %vm907_vm9, %v1264_v34  ;;  %1053 = vmatprep.subr.bf16.mxu0 %v1262_v5 }
  0x8d   :  { %v75_v37 = vpop.permute.xlu1 %74  ;;  %v72_v38 = vpop.permute.xlu0 %71 }
  0x8e   :  { %vm83_vm10 = vcmp.eq.s32.totalorder %v75_v37, %v51_v31  ;;  %vm82_vm11 = vcmp.eq.s32.totalorder %v72_v38, %v51_v31  ;;  %v1240_v38 = vld [vmem:[%s1645_s5 + $0x18] sm:$0xff]  }
  0x8f   :  { %vm909_vm12 = vmpackc.low %vm83_vm10, %vm82_vm11  ;;  %1054 = vmatpush3.bf16.msra.mxu0 %v1344_v11 }
  0x90   :  { %1055 = vmatprep.subr.bf16.mxu0 %v1262_v5 }
  0x92   :  { %1028 = vmatmul.mubr.msk.bf16.gmra.mrb[4].mxu0 %vm909_vm12, %v1264_v34 }
  0x93   :  { %1056 = vmatpush3.bf16.msra.mxu0 %v1362_v15  ;;  %1067 = vmatprep.mubr.msk.bf16.mxu0 %vm1263_vm0, %v1262_v5 }
  0x94   :  { %1057 = vmatprep.subr.bf16.mxu0 %v1262_v5 }
  0x97   :  { %1058 = vmatpush3.bf16.msra.mxu0 %v1372_v17 }
  0x98   :  { %1059 = vmatprep.subr.bf16.mxu0 %v1262_v5 }
  0x9b   :  { %1060 = vmatpush3.bf16.msra.mxu0 %v1382_v19 }
  0x9c   :  { %1061 = vmatprep.subr.bf16.mxu0 %v1262_v5 }
  0x9f   :  { %1062 = vmatpush3.bf16.msra.mxu0 %v1392_v21 }
  0xa0   :  { %1063 = vmatprep.subr.bf16.mxu0 %v1262_v5 }
  0xa3   :  { %1064 = vmatpush3.bf16.msra.mxu0 %v1402_v23 }
  0xa4   :  { %1065 = vmatprep.subr.bf16.mxu0 %v1262_v5 }
  0xa7   :  { %1066 = vmatpush3.bf16.msra.mxu0 %v1412_v25 }
  0xa8   :  { %1091 = vmatprep.subr.bf16.mxu0 %v1262_v5 }
  0xf7   :  { %v369_v39 = vpop.f32.mrb[0].mxu1 }
  0xf8   :  { %v1049_v40 = vpop.f32.mrb[1].mxu1 }
  0xf9   :  { %v372_v41 = vpop.f32.mrb[2].mxu1  ;;  %v1242_v40 = vld [vmem:[%s1645_s5 + $0x28] sm:$0xff]  }
  0xfa   :  { %v1050_v42 = vpop.f32.mrb[3].mxu1  ;;  %v1243_v41 = vld [vmem:[%s1645_s5 + $0x30] sm:$0xff]  }
  0xfb   :  { %v1244_v42 = vld [vmem:[%s1645_s5 + $0x38] sm:$0xff]  }
 0x15d   :  { %v1025_v44 = vpop.f32.mrb[0].mxu0 }
 0x15e   :  { %v1460_v45 = vadd.f32 %v1025_v44, %v869_v43  ;;  %v228_v46 = vpop.f32.mrb[1].mxu0 }
 0x15f   :  { %v229_v47 = vadd.f32 %v869_v43, %v228_v46  ;;  %v1026_v48 = vpop.f32.mrb[2].mxu0 }
 0x160   :  { %v1462_v49 = vadd.f32 %v1026_v48, %v869_v43  ;;  %v231_v50 = vpop.f32.mrb[3].mxu0 }
 0x161   :  { %v375_v51 = vadd.f32 %v369_v39, %v229_v47  ;;  %v232_v52 = vadd.f32 %v869_v43, %v231_v50  ;;  %v1241_v39 = vld [vmem:[%s1645_s5 + $0x20] sm:$0xff]  }
 0x163   :  { %1245 = vtanh.f32 %v375_v51 }
 0x165   :  { %v1029_v53 = vpop.f32.mrb[4].mxu0 }
 0x166   :  { %v1464_v54 = vadd.f32 %v1029_v53, %v869_v43  ;;  %v244_v55 = vpop.f32.mrb[5].mxu0 }
 0x167   :  { %v1466_v56 = vadd.f32 %v869_v43, %v244_v55  ;;  %v1030_v57 = vpop.f32.mrb[6].mxu0 }
 0x168   :  { %v1468_v58 = vadd.f32 %v1030_v57, %v869_v43  ;;  %v247_v59 = vpop.f32.mrb[7].mxu0 }
 0x169   :  { %v1470_v60 = vadd.f32 %v869_v43, %v247_v59 }
 0x16d   :  { %v1472_v61 = vpop.eup %1245 }
 0x16e   :  { %v380_v62 = vpack.c.bf16 %v1472_v61, %v1472_v61 }
 0x170   :  { %1068 = vmatmul.mubr.bf16.vlgmr.msra.gmra.mrb[8].mxu0 %v380_v62 }
 0x171   :  { %1092 = vmatpush3.bf16.msra.mxu0 %v1335_v9  ;;  %1107 = vmatprep.mubr.msk.bf16.mxu0 %vm1263_vm0, %v1262_v5 }
 0x172   :  { %1093 = vmatprep.subr.bf16.mxu0 %v1262_v5 }
 0x175   :  { %1094 = vmatpush3.bf16.msra.mxu0 %v1344_v11 }
 0x176   :  { %1095 = vmatprep.subr.bf16.mxu0 %v1262_v5 }
 0x179   :  { %1096 = vmatpush3.bf16.msra.mxu0 %v1362_v15 }
 0x17a   :  { %1097 = vmatprep.subr.bf16.mxu0 %v1262_v5 }
 0x17d   :  { %1098 = vmatpush3.bf16.msra.mxu0 %v1372_v17 }
 0x17e   :  { %1099 = vmatprep.subr.bf16.mxu0 %v1262_v5 }
 0x181   :  { %1100 = vmatpush3.bf16.msra.mxu0 %v1382_v19 }
 0x182   :  { %1101 = vmatprep.subr.bf16.mxu0 %v1262_v5 }
 0x185   :  { %1102 = vmatpush3.bf16.msra.mxu0 %v1392_v21 }
 0x186   :  { %1103 = vmatprep.subr.bf16.mxu0 %v1262_v5 }
 0x189   :  { %1104 = vmatpush3.bf16.msra.mxu0 %v1402_v23 }
 0x18a   :  { %1105 = vmatprep.subr.bf16.mxu0 %v1262_v5 }
 0x18d   :  { %1106 = vmatpush3.bf16.msra.mxu0 %v1412_v25 }
 0x18e   :  { %1131 = vmatprep.subr.bf16.mxu0 %v1262_v5 }
 0x243   :  { %v415_v63 = vpop.f32.mrb[8].mxu0 }
 0x244   :  { %v421_v0 = vadd.f32 %v415_v63, %v232_v52  ;;  %v1069_v1 = vpop.f32.mrb[9].mxu0  ;;  %v890_v52 = vld [vmem:[%s1646_s6] ss:$0 sm:$0xff] }
 0x245   :  { %v418_v2 = vpop.f32.mrb[10].mxu0 }
 0x246   :  { %1247 = vtanh.f32 %v421_v0  ;;  %v1070_v3 = vpop.f32.mrb[11].mxu0 }
 0x250   :  { %v1494_v4 = vpop.eup %1247 }
 0x251   :  { %v426_v6 = vpack.c.bf16 %v1494_v4, %v1494_v4 }
 0x253   :  { %1088 = vmatmul.mubr.bf16.vlgmr.msra.gmra.mrb[4].mxu1 %v426_v6 }
 0x254   :  { %1112 = vmatpush3.bf16.msra.mxu1 %v1335_v9  ;;  %1127 = vmatprep.mubr.msk.bf16.mxu1 %vm1263_vm0, %v1262_v5 }
 0x255   :  { %1113 = vmatprep.subr.bf16.mxu1 %v1262_v5 }
 0x258   :  { %1114 = vmatpush3.bf16.msra.mxu1 %v1344_v11 }
 0x259   :  { %1115 = vmatprep.subr.bf16.mxu1 %v1262_v5 }
 0x25c   :  { %1116 = vmatpush3.bf16.msra.mxu1 %v1362_v15 }
 0x25d   :  { %1117 = vmatprep.subr.bf16.mxu1 %v1262_v5 }
 0x260   :  { %1118 = vmatpush3.bf16.msra.mxu1 %v1372_v17 }
 0x261   :  { %1119 = vmatprep.subr.bf16.mxu1 %v1262_v5 }
 0x264   :  { %1120 = vmatpush3.bf16.msra.mxu1 %v1382_v19 }
 0x265   :  { %1121 = vmatprep.subr.bf16.mxu1 %v1262_v5 }
 0x268   :  { %1122 = vmatpush3.bf16.msra.mxu1 %v1392_v21 }
 0x269   :  { %1123 = vmatprep.subr.bf16.mxu1 %v1262_v5 }
 0x26c   :  { %1124 = vmatpush3.bf16.msra.mxu1 %v1402_v23 }
 0x26d   :  { %1125 = vmatprep.subr.bf16.mxu1 %v1262_v5 }
 0x270   :  { %1126 = vmatpush3.bf16.msra.mxu1 %v1412_v25 }
 0x271   :  { %1151 = vmatprep.subr.bf16.mxu1 %v1262_v5 }
 0x326   :  { %v461_v7 = vpop.f32.mrb[4].mxu1 }
 0x327   :  { %v467_v8 = vadd.f32 %v461_v7, %v1460_v45  ;;  %v1089_v10 = vpop.f32.mrb[5].mxu1 }
 0x328   :  { %v464_v12 = vpop.f32.mrb[6].mxu1 }
 0x329   :  { %1249 = vtanh.f32 %v467_v8  ;;  %v1090_v13 = vpop.f32.mrb[7].mxu1 }
 0x333   :  { %v1517_v14 = vpop.eup %1249 }
 0x334   :  { %v472_v16 = vpack.c.bf16 %v1517_v14, %v1517_v14 }
 0x336   :  { %1108 = vmatmul.mubr.bf16.vlgmr.msra.gmra.mrb[12].mxu0 %v472_v16 }
 0x337   :  { %1132 = vmatpush3.bf16.msra.mxu0 %v1335_v9  ;;  %1147 = vmatprep.mubr.msk.bf16.mxu0 %vm1263_vm0, %v1262_v5 }
 0x338   :  { %1133 = vmatprep.subr.bf16.mxu0 %v1262_v5 }
 0x33b   :  { %1134 = vmatpush3.bf16.msra.mxu0 %v1344_v11 }
 0x33c   :  { %1135 = vmatprep.subr.bf16.mxu0 %v1262_v5 }
 0x33f   :  { %1136 = vmatpush3.bf16.msra.mxu0 %v1362_v15 }
 0x340   :  { %1137 = vmatprep.subr.bf16.mxu0 %v1262_v5 }
 0x343   :  { %1138 = vmatpush3.bf16.msra.mxu0 %v1372_v17 }
 0x344   :  { %1139 = vmatprep.subr.bf16.mxu0 %v1262_v5 }
 0x347   :  { %1140 = vmatpush3.bf16.msra.mxu0 %v1382_v19 }
 0x348   :  { %1141 = vmatprep.subr.bf16.mxu0 %v1262_v5 }
 0x34b   :  { %1142 = vmatpush3.bf16.msra.mxu0 %v1392_v21 }
 0x34c   :  { %1143 = vmatprep.subr.bf16.mxu0 %v1262_v5 }
 0x34f   :  { %1144 = vmatpush3.bf16.msra.mxu0 %v1402_v23 }
 0x350   :  { %1145 = vmatprep.subr.bf16.mxu0 %v1262_v5 }
 0x353   :  { %1146 = vmatpush3.bf16.msra.mxu0 %v1412_v25 }
 0x354   :  { %1171 = vmatprep.subr.bf16.mxu0 %v1262_v5 }
 0x409   :  { %v507_v18 = vpop.f32.mrb[12].mxu0 }
 0x40a   :  { %v513_v20 = vadd.f32 %v507_v18, %v1462_v49  ;;  %v1109_v22 = vpop.f32.mrb[13].mxu0 }
 0x40b   :  { %v510_v24 = vpop.f32.mrb[14].mxu0 }
 0x40c   :  { %1251 = vtanh.f32 %v513_v20  ;;  %v1110_v26 = vpop.f32.mrb[15].mxu0 }
 0x416   :  { %v1540_v27 = vpop.eup %1251 }
 0x417   :  { %v518_v28 = vpack.c.bf16 %v1540_v27, %v1540_v27  ;;  %v714_v43 = vpack.c.bf16 %v1540_v27, %v1517_v14 }
 0x419   :  { %1128 = vmatmul.mubr.bf16.vlgmr.msra.gmra.mrb[8].mxu1 %v518_v28 }
 0x41a   :  { %1152 = vmatpush3.bf16.msra.mxu1 %v1335_v9  ;;  %1167 = vmatprep.mubr.msk.bf16.mxu1 %vm1263_vm0, %v1262_v5 }
 0x41b   :  { %1153 = vmatprep.subr.bf16.mxu1 %v1262_v5 }
 0x41e   :  { %1154 = vmatpush3.bf16.msra.mxu1 %v1344_v11 }
 0x41f   :  { %1155 = vmatprep.subr.bf16.mxu1 %v1262_v5 }
 0x422   :  { %1156 = vmatpush3.bf16.msra.mxu1 %v1362_v15 }
 0x423   :  { %1157 = vmatprep.subr.bf16.mxu1 %v1262_v5 }
 0x426   :  { %1158 = vmatpush3.bf16.msra.mxu1 %v1372_v17 }
 0x427   :  { %1159 = vmatprep.subr.bf16.mxu1 %v1262_v5 }
 0x42a   :  { %1160 = vmatpush3.bf16.msra.mxu1 %v1382_v19 }
 0x42b   :  { %1161 = vmatprep.subr.bf16.mxu1 %v1262_v5 }
 0x42e   :  { %1162 = vmatpush3.bf16.msra.mxu1 %v1392_v21 }
 0x42f   :  { %1163 = vmatprep.subr.bf16.mxu1 %v1262_v5 }
 0x432   :  { %1164 = vmatpush3.bf16.msra.mxu1 %v1402_v23 }
 0x433   :  { %1165 = vmatprep.subr.bf16.mxu1 %v1262_v5 }
 0x436   :  { %1166 = vmatpush3.bf16.msra.mxu1 %v1412_v25 }
 0x4ec   :  { %v553_v29 = vpop.f32.mrb[8].mxu1 }
 0x4ed   :  { %v559_v30 = vadd.f32 %v553_v29, %v1466_v56  ;;  %v1129_v31 = vpop.f32.mrb[9].mxu1 }
 0x4ee   :  { %v556_v32 = vpop.f32.mrb[10].mxu1 }
 0x4ef   :  { %1253 = vtanh.f32 %v559_v30  ;;  %v1130_v33 = vpop.f32.mrb[11].mxu1 }
 0x4f9   :  { %v1254_v34 = vpop.eup %1253 }
 0x4fa   :  { %v564_v35 = vpack.c.bf16 %v1254_v34, %v1254_v34 }
 0x4fc   :  { %1148 = vmatmul.mubr.bf16.vlgmr.msra.gmra.mrb[16].mxu0 %v564_v35 }
 0x4fd   :  { %1172 = vmatpush3.bf16.msra.mxu0 %v1335_v9  ;;  %1187 = vmatprep.mubr.msk.bf16.mxu0 %vm1263_vm0, %v1262_v5  ;;  %v1237_v9 = vld [vmem:[%s1645_s5] sm:$0xff]  }
 0x4fe   :  { %1173 = vmatprep.subr.bf16.mxu0 %v1262_v5  ;;  %1191 = vmatprep.subr.bf16.mxu1 %v1237_v9 }
 0x501   :  { %1174 = vmatpush3.bf16.msra.mxu0 %v1344_v11 }
 0x502   :  { %1175 = vmatprep.subr.bf16.mxu0 %v1262_v5 }
 0x505   :  { %1176 = vmatpush3.bf16.msra.mxu0 %v1362_v15 }
 0x506   :  { %1177 = vmatprep.subr.bf16.mxu0 %v1262_v5 }
 0x509   :  { %1178 = vmatpush3.bf16.msra.mxu0 %v1372_v17 }
 0x50a   :  { %1179 = vmatprep.subr.bf16.mxu0 %v1262_v5 }
 0x50d   :  { %1180 = vmatpush3.bf16.msra.mxu0 %v1382_v19 }
 0x50e   :  { %1181 = vmatprep.subr.bf16.mxu0 %v1262_v5 }
 0x511   :  { %1182 = vmatpush3.bf16.msra.mxu0 %v1392_v21 }
 0x512   :  { %1183 = vmatprep.subr.bf16.mxu0 %v1262_v5 }
 0x515   :  { %1184 = vmatpush3.bf16.msra.mxu0 %v1402_v23  ;;  %v713_v23 = vpack.c.bf16 %v1494_v4, %v1472_v61 }
 0x516   :  { %1185 = vmatprep.subr.bf16.mxu0 %v1262_v5  ;;  %v1238_v5 = vld [vmem:[%s1645_s5 + $0x8] sm:$0xff]  }
 0x519   :  { %1186 = vmatpush3.bf16.msra.mxu0 %v1412_v25  ;;  %v1239_v25 = vld [vmem:[%s1645_s5 + $0x10] sm:$0xff]  }
 0x5cf   :  { %v599_v11 = vpop.f32.mrb[16].mxu0 }
 0x5d0   :  { %v605_v15 = vadd.f32 %v599_v11, %v1470_v60  ;;  %v1149_v17 = vpop.f32.mrb[17].mxu0 }
 0x5d1   :  { %v602_v19 = vpop.f32.mrb[18].mxu0 }
 0x5d2   :  { %1255 = vtanh.f32 %v605_v15  ;;  %v1150_v21 = vpop.f32.mrb[19].mxu0 }
 0x5dc   :  { %v1256_v36 = vpop.eup %1255 }
 0x5dd   :  { %v610_v37 = vpack.c.bf16 %v1256_v36, %v1256_v36  ;;  %v715_v44 = vpack.c.bf16 %v1256_v36, %v1254_v34 }
 0x5df   :  { %1168 = vmatmul.mubr.bf16.vlgmr.msra.gmra.mrb[12].mxu1 %v610_v37 }
 0x5e0   :  { %1192 = vmatpush3.bf16.msra.mxu1 %v1237_v9  ;;  %1207 = vmatprep.mubr.bf16.mxu1 %v713_v23 }
 0x5e1   :  { %1193 = vmatprep.subr.bf16.mxu1 %v1238_v5 }
 0x5e4   :  { %1194 = vmatpush3.bf16.msra.mxu1 %v1238_v5 }
 0x5e5   :  { %1195 = vmatprep.subr.bf16.mxu1 %v1239_v25 }
 0x5e8   :  { %1196 = vmatpush3.bf16.msra.mxu1 %v1239_v25 }
 0x5e9   :  { %1197 = vmatprep.subr.bf16.mxu1 %v1240_v38 }
 0x5ec   :  { %1198 = vmatpush3.bf16.msra.mxu1 %v1240_v38 }
 0x5ed   :  { %1199 = vmatprep.subr.bf16.mxu1 %v1241_v39 }
 0x5f0   :  { %1200 = vmatpush3.bf16.msra.mxu1 %v1241_v39 }
 0x5f1   :  { %1201 = vmatprep.subr.bf16.mxu1 %v1242_v40 }
 0x5f4   :  { %1202 = vmatpush3.bf16.msra.mxu1 %v1242_v40 }
 0x5f5   :  { %1203 = vmatprep.subr.bf16.mxu1 %v1243_v41 }
 0x5f8   :  { %1204 = vmatpush3.bf16.msra.mxu1 %v1243_v41 }
 0x5f9   :  { %1205 = vmatprep.subr.bf16.mxu1 %v1244_v42 }
 0x5fc   :  { %1206 = vmatpush3.bf16.msra.mxu1 %v1244_v42 }
 0x5ff   :  { %1208 = vmatmul.mubr.bf16.vlgmr.msra.gmra.mrb[16].mxu1 %v714_v43 }
 0x600   :  { %1211 = vmatprep.mubr.bf16.mxu1 %v715_v44 }
 0x6b2   :  { %v645_v45 = vpop.f32.mrb[12].mxu1 }
 0x6b3   :  { %v651_v46 = vadd.f32 %v645_v45, %v1464_v54  ;;  %v1169_v47 = vpop.f32.mrb[13].mxu1 }
 0x6b4   :  { %v648_v48 = vpop.f32.mrb[14].mxu1 }
 0x6b5   :  { %1257 = vtanh.f32 %v651_v46  ;;  %v1170_v49 = vpop.f32.mrb[15].mxu1 }
 0x6bf   :  { %v1258_v50 = vpop.eup %1257 }
 0x6c0   :  { %v656_v51 = vpack.c.bf16 %v1258_v50, %v1258_v50 }
 0x6c2   :  { %1188 = vmatmul.mubr.bf16.vlgmr.msra.gmra.mrb[20].mxu0 %v656_v51 }
 0x6d2   :  { %v1209_v53 = vpop.f32.mrb[16].mxu1 }
 0x6d3   :  { %v831_v55 = vadd.f32 %v1209_v53, %v890_v52  ;;  %v822_v56 = vpop.f32.mrb[17].mxu1 }
 0x6d4   :  { %v823_v57 = vadd.f32 %v890_v52, %v822_v56  ;;  %v1210_v59 = vpop.f32.mrb[18].mxu1 }
 0x6d5   :  { %855 = vst [vmem:[%s1647_s7 + $0x10] sm:$0xff] %v831_v55  ;;  %v834_v54 = vadd.f32 %v1210_v59, %v890_v52  ;;  %v825_v60 = vpop.f32.mrb[19].mxu1 }
 0x6d6   :  { %853 = vst [vmem:[%s1647_s7] sm:$0xff] %v823_v57  ;;  %v826_v61 = vadd.f32 %v890_v52, %v825_v60 }
 0x6d7   :  { %856 = vst [vmem:[%s1647_s7 + $0x18] sm:$0xff] %v834_v54 }
 0x6d8   :  { %854 = vst [vmem:[%s1647_s7 + $0x8] sm:$0xff] %v826_v61 }
 0x795   :  { %v691_v62 = vpop.f32.mrb[20].mxu0 }
 0x796   :  { %v697_v63 = vadd.f32 %v691_v62, %v1468_v58  ;;  %v1189_v0 = vpop.f32.mrb[21].mxu0 }
 0x797   :  { %v694_v1 = vpop.f32.mrb[22].mxu0 }
 0x798   :  { %1259 = vtanh.f32 %v697_v63  ;;  %v1190_v2 = vpop.f32.mrb[23].mxu0 }
 0x7a2   :  { %v1260_v3 = vpop.eup %1259 }
 0x7a3   :  { %704 = vst [vmem:[%s1648_s8] sm:$0xff] %v1260_v3  ;;  %v716_v4 = vpack.c.bf16 %v1260_v3, %v1258_v50 }
 0x7a5   :  { %1212 = vmatmul.mubr.bf16.gmra.mrb[20].mxu1 %v716_v4 }
 0x878   :  { %v1213_v6 = vpop.f32.mrb[20].mxu1 }
 0x879   :  { %v847_v7 = vadd.f32 %v1213_v6, %v890_v52  ;;  %v838_v8 = vpop.f32.mrb[21].mxu1 }
 0x87a   :  { %v839_v10 = vadd.f32 %v890_v52, %v838_v8  ;;  %v1214_v12 = vpop.f32.mrb[22].mxu1 }
 0x87b   :  { %859 = vst [vmem:[%s1647_s7 + $0x30] sm:$0xff] %v847_v7  ;;  %v850_v58 = vadd.f32 %v1214_v12, %v890_v52  ;;  %v841_v13 = vpop.f32.mrb[23].mxu1 }
 0x87c   :  { %857 = vst [vmem:[%s1647_s7 + $0x20] sm:$0xff] %v839_v10  ;;  %v842_v14 = vadd.f32 %v890_v52, %v841_v13 }
 0x87d   :  { %860 = vst [vmem:[%s1647_s7 + $0x38] sm:$0xff] %v850_v58 }
 0x87e   :  { %858 = vst [vmem:[%s1647_s7 + $0x28] sm:$0xff] %v842_v14 }

</bundles_post_ra>
